<compile_context>
chip_gen: v7x
topology: tpu7x:2x2x1
jax: 0.10.0
libtpu: 0.0.40
codegen_flags: <defaults>
</compile_context>

<pallas_src>
import functools

import jax
import jax.numpy as jnp
from jax.experimental import pallas as pl
from jax.experimental.pallas import tpu as pltpu

H1 = 256   # layer-1 width per head
H2 = 64    # layer-2 width per head


def _mos_heads_kernel(wav_ref, text_ref, w1_ref, w2_ref, w3_ref, b_ref, out_ref):
    """Both MLP heads (no nonlinearity, matching the reference) in 3 matmuls."""
    # In-register lane concat; the (B, 2D) combine_embed never touches HBM.
    x = jnp.concatenate([wav_ref[...], text_ref[...]], axis=-1)          # (B, 2D)

    # Layer 1: block columns [overall | textual]  -> (B, 512)
    h1 = (jnp.dot(x, w1_ref[...], preferred_element_type=jnp.float32)
          + b_ref[:, 0:2 * H1])
    # Layer 2: block-diagonal (512, 128)          -> (B, 128)
    h2 = (jnp.dot(h1, w2_ref[...], preferred_element_type=jnp.float32)
          + b_ref[:, 2 * H1:2 * H1 + 2 * H2])
    # Layer 3: (128, 2) -> packed [out1 | out2]   -> (B, 2), single store.
    out = (jnp.dot(h2, w3_ref[...], preferred_element_type=jnp.float32)
           + b_ref[:, 2 * H1 + 2 * H2:2 * H1 + 2 * H2 + 2])
    out_ref[...] = out.astype(out_ref.dtype)


def _pack_params(params, feat_dim):
    """One-time repack of the 12 per-layer tensors into 4 slabs.

    Weights are stored as (in_features, out_features) = W_pytorch.T, so the
    kernel computes y = x @ W + b directly on the MXU.  Zero blocks contribute
    exactly 0.0, preserving per-layer f32 numerics.
    """
    o, t = params["overall"], params["textual"]
    D = feat_dim
    f32 = jnp.float32

    # Layer 1 slab: (2D, 512). Overall head only sees the wav rows.
    w1_overall = jnp.concatenate([o["w1"], jnp.zeros((D, H1), f32)], axis=0)   # (2D, 256)
    w1_slab = jnp.concatenate([w1_overall, t["w1"]], axis=1)                   # (2D, 512)

    # Layer 2 slab: (512, 128), block-diagonal.
    top = jnp.concatenate([o["w2"], jnp.zeros((H1, H2), f32)], axis=1)         # (256, 128)
    bot = jnp.concatenate([jnp.zeros((H1, H2), f32), t["w2"]], axis=1)         # (256, 128)
    w2_slab = jnp.concatenate([top, bot], axis=0)                              # (512, 128)

    # Layer 3 slab: (128, 2), block-diagonal -> packed (B, 2) output.
    top3 = jnp.concatenate([o["w3"], jnp.zeros((H2, 1), f32)], axis=1)         # (64, 2)
    bot3 = jnp.concatenate([jnp.zeros((H2, 1), f32), t["w3"]], axis=1)         # (64, 2)
    w3_slab = jnp.concatenate([top3, bot3], axis=0)                            # (128, 2)

    # Bias slab: (1, 642) = [b1_o | b1_t | b2_o | b2_t | b3_o | b3_t].
    # Static in-kernel slices start at lane offsets 0 / 512 / 640 (128-aligned).
    b_slab = jnp.concatenate(
        [o["b1"], t["b1"], o["b2"], t["b2"], o["b3"], t["b3"]], axis=1)        # (1, 642)

    return w1_slab, w2_slab, w3_slab, b_slab


def mos_predictor_forward(wav_embed, text_embed, params):
    """Pallas implementation of MosPredictor.forward given upstream embeddings."""
    B, D = wav_embed.shape
    w1_slab, w2_slab, w3_slab, b_slab = _pack_params(params, D)

    operands = (wav_embed, text_embed, w1_slab, w2_slab, w3_slab, b_slab)
    vmem = pl.BlockSpec(memory_space=pltpu.MemorySpace.VMEM)

    flops = 2 * B * (2 * D * 2 * H1 + 2 * H1 * 2 * H2 + 2 * H2 * 2)
    bytes_accessed = (sum(int(x.size) * x.dtype.itemsize for x in operands)
                      + B * 2 * 4)

    packed = pl.pallas_call(
        _mos_heads_kernel,
        out_shape=jax.ShapeDtypeStruct((B, 2), jnp.float32),
        in_specs=[vmem] * len(operands),
        out_specs=vmem,
        cost_estimate=pl.CostEstimate(
            flops=flops, transcendentals=0, bytes_accessed=bytes_accessed),
    )(*operands)

    out1 = packed[:, 0:1]
    out2 = packed[:, 1:2]
    return out1, out2


def init_linear(key, in_features, out_features):
    """Deterministic Linear params. Weight returned as (in, out) = W_pytorch.T."""
    kw, kb = jax.random.split(key)
    bound = 1.0 / jnp.sqrt(in_features)
    w = jax.random.uniform(kw, (in_features, out_features), jnp.float32, -bound, bound)
    b = jax.random.uniform(kb, (1, out_features), jnp.float32, -bound, bound)
    return w, b


def reference_forward(wav_embed, text_embed, params):
    """Plain-JAX layer-by-layer reference (mirrors the PyTorch module exactly)."""
    combine_embed = jnp.concatenate([wav_embed, text_embed], axis=-1)

    def chain(x, p):
        h1 = x @ p["w1"] + p["b1"]
        h2 = h1 @ p["w2"] + p["b2"]
        return h2 @ p["w3"] + p["b3"]

    return chain(wav_embed, params["overall"]), chain(combine_embed, params["textual"])


if __name__ == "__main__":
    B = 8          # batch
    D = 32         # upstream_feat_dim

    key = jax.random.PRNGKey(0)
    keys = jax.random.split(key, 8)

    # Synthetic upstream embeddings (stand-ins for the CLAP upstream model).
    wav_embed = jax.random.normal(keys[0], (B, D), jnp.float32)
    text_embed = jax.random.normal(keys[1], (B, D), jnp.float32)

    # Deterministic parameter init matching the module's layer shapes.
    ow1, ob1 = init_linear(keys[2], D, H1)
    ow2, ob2 = init_linear(keys[3], H1, H2)
    ow3, ob3 = init_linear(keys[4], H2, 1)
    tw1, tb1 = init_linear(keys[5], 2 * D, H1)
    tw2, tb2 = init_linear(keys[6], H1, H2)
    tw3, tb3 = init_linear(keys[7], H2, 1)

    params = {
        "overall": {"w1": ow1, "b1": ob1, "w2": ow2, "b2": ob2, "w3": ow3, "b3": ob3},
        "textual": {"w1": tw1, "b1": tb1, "w2": tw2, "b2": tb2, "w3": tw3, "b3": tb3},
    }

    out1, out2 = mos_predictor_forward(wav_embed, text_embed, params)
    out1 = jax.block_until_ready(out1)
    out2 = jax.block_until_ready(out2)

    ref1, ref2 = reference_forward(wav_embed, text_embed, params)
    assert out1.shape == (B, 1) and out2.shape == (B, 1)
    assert jnp.allclose(out1, ref1, atol=1e-4, rtol=1e-4)
    assert jnp.allclose(out2, ref2, atol=1e-4, rtol=1e-4)

    print("KERNEL_OK")
</pallas_src>

<mosaic_0001>
module attributes {stable_mosaic.version = 11 : i64} {
  func.func @_mos_heads_kernel(%arg0: memref<8x32xf32, #tpu.memory_space<vmem>>, %arg1: memref<8x32xf32, #tpu.memory_space<vmem>>, %arg2: memref<64x512xf32, #tpu.memory_space<vmem>>, %arg3: memref<512x128xf32, #tpu.memory_space<vmem>>, %arg4: memref<128x2xf32, #tpu.memory_space<vmem>>, %arg5: memref<1x642xf32, #tpu.memory_space<vmem>>, %arg6: memref<8x2xf32, #tpu.memory_space<vmem>>) attributes {dimension_semantics = [], scalar_prefetch = 0 : i64, scratch_operands = 0 : i64, tpu.core_type = #tpu.core_type<tc>} {
    %c0 = arith.constant 0 : index
    %c0_0 = arith.constant 0 : index
    %0 = vector.load %arg0[%c0, %c0_0] : memref<8x32xf32, #tpu.memory_space<vmem>>, vector<8x32xf32>
    %c0_1 = arith.constant 0 : index
    %c0_2 = arith.constant 0 : index
    %1 = vector.load %arg1[%c0_1, %c0_2] : memref<8x32xf32, #tpu.memory_space<vmem>>, vector<8x32xf32>
    %2 = tpu.concatenate %0, %1 in 1 : vector<8x32xf32>, vector<8x32xf32> -> vector<8x64xf32>
    %c0_3 = arith.constant 0 : index
    %c0_4 = arith.constant 0 : index
    %3 = vector.load %arg2[%c0_3, %c0_4] : memref<64x512xf32, #tpu.memory_space<vmem>>, vector<64x512xf32>
    %cst = arith.constant dense<0.000000e+00> : vector<8x512xf32>
    %4 = tpu.matmul %2, %3, %cst {dimension_numbers = #tpu.dot_dimension_numbers<[1], [0], [0], [1], [0, 0, 1, 1], [], []>} : vector<8x64xf32>, vector<64x512xf32>, vector<8x512xf32> -> vector<8x512xf32>
    %c0_5 = arith.constant 0 : index
    %c0_6 = arith.constant 0 : index
    %5 = vector.load %arg5[%c0_5, %c0_6] : memref<1x642xf32, #tpu.memory_space<vmem>>, vector<1x512xf32>
    %6 = vector.broadcast %5 : vector<1x512xf32> to vector<8x512xf32>
    %7 = arith.addf %4, %6 : vector<8x512xf32>
    %c0_7 = arith.constant 0 : index
    %c0_8 = arith.constant 0 : index
    %8 = vector.load %arg3[%c0_7, %c0_8] : memref<512x128xf32, #tpu.memory_space<vmem>>, vector<512x128xf32>
    %cst_9 = arith.constant dense<0.000000e+00> : vector<8x128xf32>
    %9 = tpu.matmul %7, %8, %cst_9 {dimension_numbers = #tpu.dot_dimension_numbers<[1], [0], [0], [1], [0, 0, 1, 1], [], []>} : vector<8x512xf32>, vector<512x128xf32>, vector<8x128xf32> -> vector<8x128xf32>
    %c0_10 = arith.constant 0 : index
    %c512 = arith.constant 512 : index
    %10 = vector.load %arg5[%c0_10, %c512] : memref<1x642xf32, #tpu.memory_space<vmem>>, vector<1x128xf32>
    %11 = vector.broadcast %10 : vector<1x128xf32> to vector<8x128xf32>
    %12 = arith.addf %9, %11 : vector<8x128xf32>
    %c0_11 = arith.constant 0 : index
    %c0_12 = arith.constant 0 : index
    %13 = vector.load %arg4[%c0_11, %c0_12] : memref<128x2xf32, #tpu.memory_space<vmem>>, vector<128x2xf32>
    %cst_13 = arith.constant dense<0.000000e+00> : vector<8x2xf32>
    %14 = tpu.matmul %12, %13, %cst_13 {dimension_numbers = #tpu.dot_dimension_numbers<[1], [0], [0], [1], [0, 0, 1, 1], [], []>} : vector<8x128xf32>, vector<128x2xf32>, vector<8x2xf32> -> vector<8x2xf32>
    %c0_14 = arith.constant 0 : index
    %c640 = arith.constant 640 : index
    %15 = vector.load %arg5[%c0_14, %c640] : memref<1x642xf32, #tpu.memory_space<vmem>>, vector<1x2xf32>
    %16 = vector.broadcast %15 : vector<1x2xf32> to vector<8x2xf32>
    %17 = arith.addf %14, %16 : vector<8x2xf32>
    %c0_15 = arith.constant 0 : index
    %c0_16 = arith.constant 0 : index
    %18 = vector.load %arg6[%c0_15, %c0_16] : memref<8x2xf32, #tpu.memory_space<vmem>>, vector<8x2xf32>
    tpu.vector_store %arg6[%c0_15, %c0_16], %17 {strides = array<i32>} : memref<8x2xf32, #tpu.memory_space<vmem>>, vector<8x2xf32>,
    return
  }
}

</mosaic_0001>

<bundles_post_ra>
// kernel: tpu_custom_call.1
= control target key start
LH: loop header
LB: loop body
LE: loop exit
PB: predicated region body
PF: predicated region fallthrough
CT: control target
= control target key end

     0   :  { %11 = vsyncpa [#allocation3], 0  ;;  %s1013_s0 = inlined_call_operand.vmem [shape: f32[8,32], index: 0, kind: input, shape index: {}]   ;;  %s1014_s1 = inlined_call_operand.vmem [shape: f32[8,32], index: 1, kind: input, shape index: {}]   ;;  %s1015_s2 = inlined_call_operand.hbm [shape: f32[64,512], index: 2, kind: input, shape index: {}]   ;;  %s1016_s3 = inlined_call_operand.hbm [shape: f32[512,128], index: 3, kind: input, shape index: {}]   ;;  %s1017_s4 = inlined_call_operand.vmem [shape: f32[128,2], index: 4, kind: input, shape index: {}]   ;;  %s1018_s5 = inlined_call_operand.vmem [shape: f32[1,642], index: 5, kind: input, shape index: {}]   ;;  %s1019_s6 = inlined_call_operand.vmem [shape: f32[8,2], index: 6, kind: output, shape index: {}]  }
   0x1   :  { %12 = vsyncpa [#allocation5], 0  ;;  %s874_s21 = smov [#allocation2]   ;;  %s826_s25 = scalar_lea.hbm %s1015_s2, 4096 }
   0x2   :  { %s22_s22 = sshll.u32 %s874_s21, 4  ;;  %p827_p0 = scmp.ne.s32.totalorder %s1015_s2, %s826_s25  ;;  %s23_s22 = int_to_ptr.vmem [resolvable:$true] %s22_s22 }
   0x3   :  { %p830_p1 = scmp.lt.u32.totalorder %s826_s25, %s1015_s2 }
   0x5   :  { %p832_p2 = pnand %p830_p1, %p827_p0 }
   0x7   :  { %835 = shalt.err (!%p832_p2)
}
   0x8   :  { %s836_s30 = scalar_lea.vmem %s23_s22, 4096  ;;  %p841_p4 = scmp.lt.s32.totalorder %s23_s22, %s23_s22 }
   0x9   :  { %p837_p3 = scmp.ne.s32.totalorder %s23_s22, %s836_s30  ;;  %p842_p5 = scmp.lt.s32.totalorder %s836_s30, %s836_s30 }
   0xb   :  { %p843_p6 = por %p842_p5, %p841_p4 }
   0xd   :  { %p844_p7 = pnand %p843_p6, %p837_p3 }
   0xf   :  { %847 = shalt.err (!%p844_p7)
}
  0x10   :  { %s875_s7 = smov 512   ;;  %s876_s8 = smov 32  }
  0x11   :  { %28 = dma.hbm_to_vmem [thread:$0]  %s1015_s2, 4096, %s23_s22, [#allocation3], %s875_s7, %s875_s7, %s876_s8  }
  0x12   :  { %s877_s11 = smov [#allocation4]   ;;  %s848_s15 = scalar_lea.hbm %s1016_s3, 8192 }
  0x13   :  { %s34_s12 = sshll.u32 %s877_s11, 4  ;;  %p849_p8 = scmp.ne.s32.totalorder %s1016_s3, %s848_s15  ;;  %s35_s12 = int_to_ptr.vmem [resolvable:$true] %s34_s12 }
  0x14   :  { %p852_p9 = scmp.lt.u32.totalorder %s848_s15, %s1016_s3 }
  0x16   :  { %p854_p10 = pnand %p852_p9, %p849_p8 }
  0x18   :  { %857 = shalt.err (!%p854_p10)
}
  0x19   :  { %s858_s20 = scalar_lea.vmem %s35_s12, 8192  ;;  %p863_p12 = scmp.lt.s32.totalorder %s35_s12, %s35_s12 }
  0x1a   :  { %p859_p11 = scmp.ne.s32.totalorder %s35_s12, %s858_s20  ;;  %p864_p13 = scmp.lt.s32.totalorder %s858_s20, %s858_s20 }
  0x1c   :  { %p865_p0 = por %p864_p13, %p863_p12 }
  0x1e   :  { %p866_p1 = pnand %p865_p0, %p859_p11 }
  0x20   :  { %869 = shalt.err (!%p866_p1)
}
  0x21   :  { %s878_s2 = smov 128   ;;  %s879_s21 = smov 8  }
  0x22   :  { %40 = dma.hbm_to_vmem [thread:$0]  %s1016_s3, 8192, %s35_s12, [#allocation5], %s878_s2, %s878_s2, %s879_s21  }
  0x23   :  { %870 = dma.done.wait [#allocation3], 4096  }
  0x24   :  { %871 = vsyncadd [#allocation3], 4294963200 }
  0x25   :  { %872 = dma.done.wait [#allocation5], 8192  }
  0x26   :  { %873 = vsyncadd [#allocation5], 4294959104  ;;  %v880_v0 = vmov 0.0   ;;  %v52_v1 = vld [vmem:[%s1014_s1] sm:$0xff]  ;;  %v60_v2 = vld [vmem:[#allocation2 + $0x8] sm:$0xff]  ;;  %vm57_vm0 = vcmask 261120  }
  0x27   :  { %181 = vmatprep.mubr.f32.mxu1 %v880_v0  ;;  %v64_v3 = vld [vmem:[#allocation2 + $0x28] sm:$0xff]  ;;  %54 = vrot.lane.b32.xlu0 %v52_v1, %s876_s8  ;;  %v59_v5 = vld [vmem:[#allocation2] sm:$0xff]  ;;  %v62_v25 = vld [vmem:[#allocation2 + $0x18] sm:$0xff]  ;;  %vm113_vm1 = vcmask 523264   ;;  %vm882_vm2 = vmmov 0   ;;  %vm563_vm3 = vcmask 15360  }
  0x28   :  { %v697_v4 = vpack.c.bf16 %v64_v3, %v60_v2  ;;  %v63_v6 = vld [vmem:[#allocation2 + $0x20] sm:$0xff]  ;;  %v68_v7 = vld [vmem:[#allocation2 + $0x48] sm:$0xff]  ;;  %v66_v26 = vld [vmem:[#allocation2 + $0x38] sm:$0xff] }
  0x29   :  { %v699_v8 = vpack.c.bf16 %v63_v6, %v59_v5  ;;  %v72_v9 = vld [vmem:[#allocation2 + $0x68] sm:$0xff]  ;;  %v67_v10 = vld [vmem:[#allocation2 + $0x40] sm:$0xff]  ;;  %v277_v33 = vld [vmem:[#allocation4 + $0x90] sm:$0xff]  ;;  %v713_v34 = vpack.c.bf16 %v66_v26, %v62_v25 }
  0x2a   :  { %v71_v11 = vld [vmem:[#allocation2 + $0x60] sm:$0xff]  ;;  %698 = vmatprep.subr.bf16.mxu1 %v697_v4  ;;  %v701_v12 = vpack.c.bf16 %v72_v9, %v68_v7  ;;  %v76_v13 = vld [vmem:[#allocation2 + $0x88] sm:$0xff]  ;;  %v278_v36 = vld [vmem:[#allocation4 + $0x98] sm:$0xff] }
  0x2b   :  { %v80_v14 = vld [vmem:[#allocation2 + $0xa8] sm:$0xff]  ;;  %700 = vmatpush1.bf16.msra.mxu1 %v699_v8  ;;  %v703_v15 = vpack.c.bf16 %v71_v11, %v67_v10  ;;  %v75_v17 = vld [vmem:[#allocation2 + $0x80] sm:$0xff]  ;;  %v261_v37 = vld [vmem:[#allocation4 + $0x10] sm:$0xff]  ;;  %v733_v39 = vpack.c.bf16 %v278_v36, %v277_v33 }
  0x2c   :  { %702 = vmatprep.subr.bf16.mxu1 %v701_v12  ;;  %v705_v16 = vpack.c.bf16 %v80_v14, %v76_v13  ;;  %v79_v18 = vld [vmem:[#allocation2 + $0xa0] sm:$0xff]  ;;  %v84_v19 = vld [vmem:[#allocation2 + $0xc8] sm:$0xff]  ;;  %v262_v38 = vld [vmem:[#allocation4 + $0x18] sm:$0xff] }
  0x2d   :  { %v88_v20 = vld [vmem:[#allocation2 + $0xe8] sm:$0xff]  ;;  %v707_v21 = vpack.c.bf16 %v79_v18, %v75_v17  ;;  %v83_v23 = vld [vmem:[#allocation2 + $0xc0] sm:$0xff]  ;;  %v735_v42 = vpack.c.bf16 %v262_v38, %v261_v37  ;;  %v281_v46 = vld [vmem:[#allocation4 + $0xb0] sm:$0xff] }
  0x2e   :  { %v709_v22 = vpack.c.bf16 %v88_v20, %v84_v19  ;;  %v87_v24 = vld [vmem:[#allocation2 + $0xe0] sm:$0xff]  ;;  %v276_v28 = vld [vmem:[#allocation4 + $0x88] sm:$0xff]  ;;  %v282_v47 = vld [vmem:[#allocation4 + $0xb8] sm:$0xff] }
  0x2f   :  { %704 = vmatpush1.bf16.msra.mxu1 %v703_v15  ;;  %v275_v27 = vld [vmem:[#allocation4 + $0x80] sm:$0xff]  ;;  %v711_v29 = vpack.c.bf16 %v87_v24, %v83_v23  ;;  %v260_v32 = vld [vmem:[#allocation4 + $0x8] sm:$0xff]  ;;  %v741_v49 = vpack.c.bf16 %v282_v47, %v281_v46  ;;  %v265_v50 = vld [vmem:[#allocation4 + $0x30] sm:$0xff] }
  0x30   :  { %706 = vmatprep.subr.bf16.mxu1 %v705_v16  ;;  %v729_v30 = vpack.c.bf16 %v276_v28, %v275_v27  ;;  %v259_v31 = vld [vmem:[#allocation4] sm:$0xff]  ;;  %v280_v41 = vld [vmem:[#allocation4 + $0xa8] sm:$0xff]  ;;  %v266_v51 = vld [vmem:[#allocation4 + $0x38] sm:$0xff] }
  0x31   :  { %v731_v35 = vpack.c.bf16 %v260_v32, %v259_v31  ;;  %v279_v40 = vld [vmem:[#allocation4 + $0xa0] sm:$0xff]  ;;  %v264_v45 = vld [vmem:[#allocation4 + $0x28] sm:$0xff]  ;;  %v743_v54 = vpack.c.bf16 %v266_v51, %v265_v50  ;;  %v285_v58 = vld [vmem:[#allocation4 + $0xd0] sm:$0xff] }
  0x32   :  { %730 = vmatprep.subr.bf16.mxu0 %v729_v30  ;;  %v737_v43 = vpack.c.bf16 %v280_v41, %v279_v40  ;;  %v263_v44 = vld [vmem:[#allocation4 + $0x20] sm:$0xff]  ;;  %v284_v53 = vld [vmem:[#allocation4 + $0xc8] sm:$0xff]  ;;  %v286_v59 = vld [vmem:[#allocation4 + $0xd8] sm:$0xff] }
  0x33   :  { %708 = vmatpush1.bf16.msra.mxu1 %v707_v21  ;;  %732 = vmatpush3.bf16.msra.mxu0 %v731_v35  ;;  %v739_v48 = vpack.c.bf16 %v264_v45, %v263_v44  ;;  %v283_v52 = vld [vmem:[#allocation4 + $0xc0] sm:$0xff]  ;;  %v268_v57 = vld [vmem:[#allocation4 + $0x48] sm:$0xff]  ;;  %v749_v61 = vpack.c.bf16 %v286_v59, %v285_v58  ;;  %v269_v62 = vld [vmem:[#allocation4 + $0x50] sm:$0xff] }
  0x34   :  { %710 = vmatprep.subr.bf16.mxu1 %v709_v22  ;;  %734 = vmatprep.subr.bf16.mxu0 %v733_v39  ;;  %v745_v55 = vpack.c.bf16 %v284_v53, %v283_v52  ;;  %v267_v56 = vld [vmem:[#allocation4 + $0x40] sm:$0xff]  ;;  %v270_v63 = vld [vmem:[#allocation4 + $0x58] sm:$0xff]  ;;  %v288_v2 = vld [vmem:[#allocation4 + $0xe8] sm:$0xff] }
  0x35   :  { %v747_v60 = vpack.c.bf16 %v268_v57, %v267_v56  ;;  %v287_v1 = vld [vmem:[#allocation4 + $0xe0] sm:$0xff]  ;;  %v751_v3 = vpack.c.bf16 %v270_v63, %v269_v62  ;;  %v272_v6 = vld [vmem:[#allocation4 + $0x68] sm:$0xff]  ;;  %v61_v8 = vld [vmem:[#allocation2 + $0x10] sm:$0xff] }
  0x36   :  { %v753_v4 = vpack.c.bf16 %v288_v2, %v287_v1  ;;  %v271_v5 = vld [vmem:[#allocation4 + $0x60] sm:$0xff]  ;;  %v65_v9 = vld [vmem:[#allocation2 + $0x30] sm:$0xff]  ;;  %v70_v10 = vld [vmem:[#allocation2 + $0x58] sm:$0xff] }
  0x37   :  { %712 = vmatpush1.bf16.msra.mxu1 %v711_v29  ;;  %736 = vmatpush3.bf16.msra.mxu0 %v735_v42  ;;  %v755_v7 = vpack.c.bf16 %v272_v6, %v271_v5  ;;  %v74_v11 = vld [vmem:[#allocation2 + $0x78] sm:$0xff]  ;;  %v51_v12 = vld [vmem:[%s1013_s0] sm:$0xff]  ;;  %v715_v13 = vpack.c.bf16 %v65_v9, %v61_v8  ;;  %v69_v16 = vld [vmem:[#allocation2 + $0x50] sm:$0xff] }
  0x38   :  { %714 = vmatprep.subr.bf16.mxu1 %v713_v34  ;;  %738 = vmatprep.subr.bf16.mxu0 %v737_v43  ;;  %v717_v15 = vpack.c.bf16 %v74_v11, %v70_v10  ;;  %v73_v17 = vld [vmem:[#allocation2 + $0x70] sm:$0xff]  ;;  %v78_v19 = vld [vmem:[#allocation2 + $0x98] sm:$0xff]  ;;  %v307_v31 = vld [vmem:[#allocation4 + $0x180] sm:$0xff] }
  0x39   :  { %v82_v20 = vld [vmem:[#allocation2 + $0xb8] sm:$0xff]  ;;  %v719_v21 = vpack.c.bf16 %v73_v17, %v69_v16  ;;  %v77_v23 = vld [vmem:[#allocation2 + $0x90] sm:$0xff]  ;;  %v308_v32 = vld [vmem:[#allocation4 + $0x188] sm:$0xff] }
  0x3a   :  { %v721_v22 = vpack.c.bf16 %v82_v20, %v78_v19  ;;  %v81_v24 = vld [vmem:[#allocation2 + $0xb0] sm:$0xff]  ;;  %v86_v25 = vld [vmem:[#allocation2 + $0xd8] sm:$0xff]  ;;  %v761_v34 = vpack.c.bf16 %v308_v32, %v307_v31  ;;  %v291_v35 = vld [vmem:[#allocation4 + $0x100] sm:$0xff] }
  0x3b   :  { %740 = vmatpush3.bf16.msra.mxu0 %v739_v48  ;;  %v90_v26 = vld [vmem:[#allocation2 + $0xf8] sm:$0xff]  ;;  %v723_v27 = vpack.c.bf16 %v81_v24, %v77_v23  ;;  %v85_v29 = vld [vmem:[#allocation2 + $0xd0] sm:$0xff]  ;;  %v292_v36 = vld [vmem:[#allocation4 + $0x108] sm:$0xff]  ;;  %v881_v23 = vmov 0.0|0.0   ;;  %v93_v24 = vlaneseq }
  0x3c   :  { %742 = vmatprep.subr.bf16.mxu0 %v741_v49  ;;  %v725_v28 = vpack.c.bf16 %v90_v26, %v86_v25  ;;  %v89_v30 = vld [vmem:[#allocation2 + $0xf0] sm:$0xff]  ;;  %v310_v38 = vld [vmem:[#allocation4 + $0x198] sm:$0xff]  ;;  %v763_v39 = vpack.c.bf16 %v292_v36, %v291_v35  ;;  %v311_v43 = vld [vmem:[#allocation4 + $0x1a0] sm:$0xff] }
  0x3d   :  { %v727_v33 = vpack.c.bf16 %v89_v30, %v85_v29  ;;  %v309_v37 = vld [vmem:[#allocation4 + $0x190] sm:$0xff]  ;;  %v294_v42 = vld [vmem:[#allocation4 + $0x118] sm:$0xff]  ;;  %v312_v44 = vld [vmem:[#allocation4 + $0x1a8] sm:$0xff]  ;;  %v94_v25 = vshrl.u32 %v93_v24, 7 }
  0x3e   :  { %v765_v40 = vpack.c.bf16 %v310_v38, %v309_v37  ;;  %v293_v41 = vld [vmem:[#allocation4 + $0x110] sm:$0xff]  ;;  %v769_v46 = vpack.c.bf16 %v312_v44, %v311_v43  ;;  %v295_v47 = vld [vmem:[#allocation4 + $0x120] sm:$0xff]  ;;  %v296_v48 = vld [vmem:[#allocation4 + $0x128] sm:$0xff] }
  0x3f   :  { %744 = vmatpush3.bf16.msra.mxu0 %v743_v54  ;;  %v767_v45 = vpack.c.bf16 %v294_v42, %v293_v41  ;;  %v771_v49 = vpack.c.bf16 %v296_v48, %v295_v47  ;;  %v313_v50 = vld [vmem:[#allocation4 + $0x1b0] sm:$0xff]  ;;  %v314_v51 = vld [vmem:[#allocation4 + $0x1b8] sm:$0xff]  ;;  %v315_v62 = vld [vmem:[#allocation4 + $0x1c0] sm:$0xff]  ;;  %v99_v26 = vsub.s32 1, %v94_v25  ;;  %v107_v43 = vsub.s32 3, %v94_v25 }
  0x40   :  { %746 = vmatprep.subr.bf16.mxu0 %v745_v55  ;;  %v773_v52 = vpack.c.bf16 %v314_v51, %v313_v50  ;;  %v289_v53 = vld [vmem:[#allocation4 + $0xf0] sm:$0xff]  ;;  %v290_v54 = vld [vmem:[#allocation4 + $0xf8] sm:$0xff]  ;;  %v316_v63 = vld [vmem:[#allocation4 + $0x1c8] sm:$0xff] }
  0x41   :  { %v297_v55 = vld [vmem:[#allocation4 + $0x130] sm:$0xff]  ;;  %v757_v56 = vpack.c.bf16 %v290_v54, %v289_v53  ;;  %v298_v57 = vld [vmem:[#allocation4 + $0x138] sm:$0xff]  ;;  %v777_v1 = vpack.c.bf16 %v316_v63, %v315_v62  ;;  %v299_v2 = vld [vmem:[#allocation4 + $0x140] sm:$0xff] }
  0x42   :  { %v273_v58 = vld [vmem:[#allocation4 + $0x70] sm:$0xff]  ;;  %v274_v59 = vld [vmem:[#allocation4 + $0x78] sm:$0xff]  ;;  %v319_v10 = vld [vmem:[#allocation4 + $0x1e0] sm:$0xff] }
  0x43   :  { %748 = vmatpush3.bf16.msra.mxu0 %v747_v60  ;;  %v775_v60 = vpack.c.bf16 %v298_v57, %v297_v55  ;;  %v317_v5 = vld [vmem:[#allocation4 + $0x1d0] sm:$0xff]  ;;  %v318_v6 = vld [vmem:[#allocation4 + $0x1d8] sm:$0xff]  ;;  %v320_v11 = vld [vmem:[#allocation4 + $0x1e8] sm:$0xff] }
  0x44   :  { %750 = vmatprep.subr.bf16.mxu0 %v749_v61  ;;  %v759_v61 = vpack.c.bf16 %v274_v59, %v273_v58  ;;  %v781_v8 = vpack.c.bf16 %v318_v6, %v317_v5  ;;  %v302_v9 = vld [vmem:[#allocation4 + $0x158] sm:$0xff]  ;;  %v321_v17 = vld [vmem:[#allocation4 + $0x1f0] sm:$0xff]  ;;  %v470_v31 = vld [vmem:[%s1017_s4] sm:$0xff] }
  0x45   :  { %v305_v20 = vld [vmem:[#allocation4 + $0x170] sm:$0xff]  ;;  %v471_v32 = vld [vmem:[%s1017_s4 + $0x8] sm:$0xff]  ;;  %v474_v41 = vld [vmem:[%s1017_s4 + $0x20] sm:$0xff] }
  0x46   :  { %v794_v36 = vpack.c.bf16 %v471_v32, %v470_v31  ;;  %v472_v38 = vld [vmem:[%s1017_s4 + $0x10] sm:$0xff]  ;;  %v475_v42 = vld [vmem:[%s1017_s4 + $0x28] sm:$0xff]  ;;  %v477_v53 = vld [vmem:[%s1017_s4 + $0x38] sm:$0xff] }
  0x47   :  { %752 = vmatpush3.bf16.msra.mxu0 %v751_v3  ;;  %v300_v3 = vld [vmem:[#allocation4 + $0x148] sm:$0xff]  ;;  %v800_v44 = vpack.c.bf16 %v475_v42, %v474_v41  ;;  %v478_v55 = vld [vmem:[%s1017_s4 + $0x40] sm:$0xff]  ;;  %v480_v57 = vld [vmem:[%s1017_s4 + $0x50] sm:$0xff] }
  0x48   :  { %754 = vmatprep.subr.bf16.mxu0 %v753_v4  ;;  %v779_v4 = vpack.c.bf16 %v300_v3, %v299_v2  ;;  %v481_v59 = vld [vmem:[%s1017_s4 + $0x58] sm:$0xff]  ;;  %v483_v62 = vld [vmem:[%s1017_s4 + $0x68] sm:$0xff] }
  0x49   :  { %v485_v2 = vld [vmem:[%s1017_s4 + $0x78] sm:$0xff] }
  0x4b   :  { %756 = vmatpush3.bf16.msra.mxu0 %v755_v7  ;;  %v301_v7 = vld [vmem:[#allocation4 + $0x150] sm:$0xff] }
  0x4c   :  { %758 = vmatprep.subr.bf16.mxu0 %v757_v56  ;;  %v479_v56 = vld [vmem:[%s1017_s4 + $0x48] sm:$0xff] }
  0x4d   :  { %v806_v58 = vpack.c.bf16 %v479_v56, %v478_v55 }
  0x4f   :  { %760 = vmatpush3.bf16.msra.mxu0 %v759_v61  ;;  %v482_v61 = vld [vmem:[%s1017_s4 + $0x60] sm:$0xff] }
  0x50   :  { %793 = vmatprep.subr.bf16.mxu0 %v881_v23  ;;  %v812_v63 = vpack.c.bf16 %v483_v62, %v482_v61 }
  0x99   :  { %v55_v14 = vpop.permute.xlu0 %54 }
  0x9a   :  { %v58_v18 = vsel %vm57_vm0, %v51_v12, %v55_v14  ;;  %v783_v12 = vpack.c.bf16 %v302_v9, %v301_v7  ;;  %v303_v14 = vld [vmem:[#allocation4 + $0x160] sm:$0xff] }
  0x9b   :  { %571 = vmatmul.mubr.msk.f32.vlgmr.msra.gmra.mrb[0].mxu1 %vm113_vm1, %v58_v18  ;;  %v573_v7 = vld [vmem:[%s1018_s5 + $0x4] ss:$0 sm:$0xff] }
  0x9c   :  { %716 = vmatpush1.bf16.msra.mxu1 %v715_v13  ;;  %252 = vmatprep.mubr.f32.mxu1 %v880_v0  ;;  %v785_v13 = vpack.c.bf16 %v320_v11, %v319_v10 }
  0x9d   :  { %718 = vmatprep.subr.bf16.mxu1 %v717_v15  ;;  %v304_v15 = vld [vmem:[#allocation4 + $0x168] sm:$0xff] }
  0x9e   :  { %v787_v16 = vpack.c.bf16 %v304_v15, %v303_v14 }
  0xa0   :  { %720 = vmatpush1.bf16.msra.mxu1 %v719_v21  ;;  %v306_v21 = vld [vmem:[#allocation4 + $0x178] sm:$0xff] }
  0xa1   :  { %722 = vmatprep.subr.bf16.mxu1 %v721_v22  ;;  %v791_v22 = vpack.c.bf16 %v306_v21, %v305_v20 }
  0xa4   :  { %724 = vmatpush1.bf16.msra.mxu1 %v723_v27  ;;  %v91_v27 = vld [vmem:[%s1018_s5] sm:$0xf] }
  0xa5   :  { %726 = vmatprep.subr.bf16.mxu1 %v725_v28  ;;  %v95_v28 = vsub.s32 0, %v94_v25  ;;  %v100_v29 = vrot.slane %v91_v27, %v99_v26 }
  0xa7   :  { %v96_v30 = vrot.slane %v91_v27, %v95_v28 }
  0xa8   :  { %728 = vmatpush1.bf16.msra.mxu1 %v727_v33 }
  0xa9   :  { %762 = vmatprep.subr.bf16.mxu1 %v761_v34 }
  0xab   :  { %572 = vmatmul.mubr.msk.f32.vlgmr.msra.gmra.mrb[2].mxu1 %vm113_vm1, %v58_v18  ;;  %v322_v18 = vld [vmem:[#allocation4 + $0x1f8] sm:$0xff] }
  0xac   :  { %764 = vmatpush3.bf16.msra.mxu1 %v763_v39  ;;  %v789_v19 = vpack.c.bf16 %v322_v18, %v321_v17  ;;  %v473_v39 = vld [vmem:[%s1017_s4 + $0x18] sm:$0xff] }
  0xad   :  { %766 = vmatprep.subr.bf16.mxu1 %v765_v40  ;;  %v797_v40 = vpack.c.bf16 %v473_v39, %v472_v38 }
  0xb0   :  { %768 = vmatpush3.bf16.msra.mxu1 %v767_v45  ;;  %v103_v45 = vsub.s32 2, %v94_v25 }
  0xb1   :  { %770 = vmatprep.subr.bf16.mxu1 %v769_v46  ;;  %v108_v46 = vrot.slane %v91_v27, %v107_v43 }
  0xb2   :  { %v104_v47 = vrot.slane %v91_v27, %v103_v45 }
  0xb4   :  { %772 = vmatpush3.bf16.msra.mxu1 %v771_v49 }
  0xb5   :  { %774 = vmatprep.subr.bf16.mxu1 %v773_v52  ;;  %v476_v52 = vld [vmem:[%s1017_s4 + $0x30] sm:$0xff] }
  0xb6   :  { %v803_v54 = vpack.c.bf16 %v477_v53, %v476_v52 }
  0xb8   :  { %776 = vmatpush3.bf16.msra.mxu1 %v775_v60  ;;  %v809_v60 = vpack.c.bf16 %v481_v59, %v480_v57 }
  0xb9   :  { %778 = vmatprep.subr.bf16.mxu1 %v777_v1  ;;  %v484_v1 = vld [vmem:[%s1017_s4 + $0x70] sm:$0xff] }
  0xba   :  { %v815_v3 = vpack.c.bf16 %v485_v2, %v484_v1 }
  0xbc   :  { %780 = vmatpush3.bf16.msra.mxu1 %v779_v4 }
  0xbd   :  { %782 = vmatprep.subr.bf16.mxu1 %v781_v8 }
  0xc0   :  { %784 = vmatpush3.bf16.msra.mxu1 %v783_v12 }
  0xc1   :  { %786 = vmatprep.subr.bf16.mxu1 %v785_v13  ;;  %v574_v13 = vld [vmem:[%s1018_s5 + $0x5] ss:$0 sm:$0xff] }
  0xc4   :  { %788 = vmatpush3.bf16.msra.mxu1 %v787_v16 }
  0xc5   :  { %790 = vmatprep.subr.bf16.mxu1 %v789_v19 }
  0xc8   :  { %792 = vmatpush3.bf16.msra.mxu1 %v791_v22 }
 0x16e   :  { %v183_v33 = vpop.f32.mrb[0].mxu1 }
 0x16f   :  { %v185_v34 = vpop.f32.mrb[1].mxu1  ;;  %v184_v37 = vadd.f32 %v183_v33, %v96_v30 }
 0x170   :  { %v186_v35 = vadd.f32 %v185_v34, %v100_v29 }
 0x172   :  { %394 = vmatprep.mubr.f32.mxu0 %v186_v35 }
 0x173   :  { %395 = vmatmul.mubr.f32.vlgmr.msra.gmra.mrb[0].mxu0 %v184_v37 }
 0x174   :  { %795 = vmatpush3.bf16.msra.mxu0 %v794_v36  ;;  %694 = vmatprep.mubr.msk.f32.mxu0 %vm882_vm2, %v880_v0 }
 0x175   :  { %796 = vmatprep.subr.bf16.mxu0 %v881_v23 }
 0x178   :  { %798 = vmatpush3.bf16.msra.mxu0 %v797_v40 }
 0x179   :  { %799 = vmatprep.subr.bf16.mxu0 %v881_v23 }
 0x17c   :  { %801 = vmatpush3.bf16.msra.mxu0 %v800_v44 }
 0x17d   :  { %802 = vmatprep.subr.bf16.mxu0 %v881_v23 }
 0x17e   :  { %v254_v48 = vpop.f32.mrb[2].mxu1 }
 0x17f   :  { %v256_v49 = vpop.f32.mrb[3].mxu1  ;;  %v255_v51 = vadd.f32 %v254_v48, %v104_v47 }
 0x180   :  { %v257_v50 = vadd.f32 %v256_v49, %v108_v46  ;;  %804 = vmatpush3.bf16.msra.mxu0 %v803_v54 }
 0x181   :  { %805 = vmatprep.subr.bf16.mxu0 %v881_v23 }
 0x182   :  { %464 = vmatprep.mubr.f32.mxu1 %v257_v50 }
 0x183   :  { %465 = vmatmul.mubr.f32.vlgmr.msra.gmra.mrb[4].mxu1 %v255_v51 }
 0x184   :  { %807 = vmatpush3.bf16.msra.mxu0 %v806_v58 }
 0x185   :  { %808 = vmatprep.subr.bf16.mxu0 %v881_v23 }
 0x188   :  { %810 = vmatpush3.bf16.msra.mxu0 %v809_v60 }
 0x189   :  { %811 = vmatprep.subr.bf16.mxu0 %v881_v23 }
 0x18c   :  { %813 = vmatpush3.bf16.msra.mxu0 %v812_v63 }
 0x18d   :  { %814 = vmatprep.subr.bf16.mxu0 %v881_v23 }
 0x190   :  { %816 = vmatpush3.bf16.msra.mxu0 %v815_v3 }
 0x246   :  { %v607_v4 = vpop.f32.mrb[0].mxu0 }
 0x247   :  { %v608_v5 = vpop.f32.mrb[1].mxu0 }
 0x248   :  { %v609_v6 = vadd.f32 %v608_v5, %v607_v4 }
 0x24a   :  { %v397_v10 = vadd.f32 %v609_v6, %v573_v7 }
 0x256   :  { %v642_v8 = vpop.f32.mrb[4].mxu1 }
 0x257   :  { %v643_v9 = vpop.f32.mrb[5].mxu1 }
 0x258   :  { %v644_v11 = vadd.f32 %v643_v9, %v642_v8 }
 0x25a   :  { %v467_v12 = vadd.f32 %v644_v11, %v397_v10 }
 0x25c   :  { %695 = vmatmul.mubr.f32.vlgmr.msra.gmra.mrb[2].mxu0 %v467_v12 }
 0x32f   :  { %v559_v14 = vpop.f32.mrb[2].mxu0 }
 0x330   :  { %v560_v0 = vadd.f32 %v574_v13, %v559_v14  ;;  %v696_v15 = vpop.f32.mrb[3].mxu0 }
 0x332   :  { %564 = vst.msk [vmem:[%s1019_s6] sm:$0xff] %vm563_vm3, %v560_v0 }
 0x333   :  { %569 = vsyncpa [#allocation3], 1 }
 0x334   :  { %570 = vsyncpa [#allocation5], 1 }

</bundles_post_ra>
